<compile_context>
chip_gen: v6e
topology: v6e:2x2x1
jax: 0.10.0
libtpu: 0.0.40
codegen_flags: <defaults>
</compile_context>

<pallas_src>
import jax
import jax.numpy as jnp
from jax.experimental import pallas as pl
from jax.experimental.pallas import tpu as pltpu


def _round_up(v: int, m: int) -> int:
    return ((v + m - 1) // m) * m


def _make_mlp_kernel(num_linear: int, act):
    """Kernel computing the full MLP chain for one (features, row-tile) block."""

    def kernel(*refs):
        x_ref = refs[0]
        param_refs = refs[1:1 + 2 * num_linear]
        out_ref = refs[-1]

        # h: (d, tile_rows) -- rows on the lane axis, features on sublanes.
        h = x_ref[...].astype(jnp.float32)
        for k in range(num_linear):
            w = param_refs[2 * k][...].astype(jnp.float32)      # (d_out, d_in)
            b = param_refs[2 * k + 1][...].astype(jnp.float32)  # (d_out, 1)
            h = jnp.dot(w, h, preferred_element_type=jnp.float32) + b
            if k < num_linear - 1:
                if act == "cos":
                    h = jnp.cos(h)
                elif act == "sin":
                    h = jnp.sin(h)
                else:  # default nn.ReLU()
                    h = jnp.maximum(h, 0.0)
        out_ref[...] = h.astype(out_ref.dtype)

    return kernel


def mlp_refiner_forward(x, params, act=None, *, tile_rows=512):
    """Pallas forward for MLPRefiner.

    Args:
      x: (..., in_dim) input.
      params: list of (W, b) pairs in PyTorch layout, W: (d_out, d_in),
              b: (d_out,).
      act: None/'relu' (ReLU), 'cos', or 'sin', applied after every hidden
           Linear (never after the last one) -- matching the PyTorch module.
      tile_rows: requested row-tile size (rounded to a multiple of 128).

    Returns:
      (..., out_dim) output, same dtype as x.
    """
    lead_shape = x.shape[:-1]
    in_dim = x.shape[-1]
    out_dim = params[-1][0].shape[0]
    num_linear = len(params)

    x2 = x.reshape(-1, in_dim)
    n_rows = x2.shape[0]

    # Lane-dense layout: rows on the lane (last) axis.  This transpose is
    # cheap XLA layout plumbing on a (N, in_dim<=32) matrix.
    xT = x2.T  # (in_dim, n_rows)

    # Tile selection: multiple of 128, as large as requested, but keep >= 2
    # parallel grid steps when there is enough work (v7x megacore).
    tile = _round_up(max(128, int(tile_rows)), 128)
    half = _round_up(max(128, -(-n_rows // 2)), 128)
    tile = min(tile, half)

    # Pad rows to a multiple of the tile (zeros), slice back afterwards.
    n_pad = _round_up(n_rows, tile)
    if n_pad != n_rows:
        xT = jnp.pad(xT, ((0, 0), (0, n_pad - n_rows)))

    kernel = _make_mlp_kernel(num_linear, act)

    # Flatten params into the call argument list: x, W0, b0, W1, b1, ...
    flat_args = [xT]
    in_specs = [pl.BlockSpec((in_dim, tile), lambda i: (0, i))]
    for (w, b) in params:
        d_out, d_in = w.shape
        flat_args.append(w)
        in_specs.append(pl.BlockSpec((d_out, d_in), lambda i: (0, 0)))
        flat_args.append(b.reshape(d_out, 1))
        in_specs.append(pl.BlockSpec((d_out, 1), lambda i: (0, 0)))

    outT = pl.pallas_call(
        kernel,
        out_shape=jax.ShapeDtypeStruct((out_dim, n_pad), x.dtype),
        grid_spec=pltpu.PrefetchScalarGridSpec(
            num_scalar_prefetch=0,
            grid=(n_pad // tile,),
            in_specs=in_specs,
            out_specs=pl.BlockSpec((out_dim, tile), lambda i: (0, i)),
        ),
        compiler_params=pltpu.CompilerParams(
            dimension_semantics=("parallel",),
        ),
    )(*flat_args)

    out = outT[:, :n_rows].T  # (n_rows, out_dim)
    return out.reshape(*lead_shape, out_dim)


def init_mlp_params(key, in_dim, out_dim, hidden_list):
    """Deterministic init mimicking nn.Linear's U(-1/sqrt(fan_in), 1/sqrt(fan_in)).

    Weights are kept in PyTorch layout (d_out, d_in).
    """
    dims = [in_dim] + list(hidden_list) + [out_dim]
    params = []
    for k in range(len(dims) - 1):
        d_in, d_out = dims[k], dims[k + 1]
        key, kw, kb = jax.random.split(key, 3)
        bound = 1.0 / jnp.sqrt(jnp.float32(d_in))
        w = jax.random.uniform(kw, (d_out, d_in), jnp.float32, -bound, bound)
        b = jax.random.uniform(kb, (d_out,), jnp.float32, -bound, bound)
        params.append((w, b))
    return params


def _reference_forward(x, params, act=None):
    """Pure-JAX reference for correctness checking (PyTorch semantics)."""
    lead_shape = x.shape[:-1]
    h = x.reshape(-1, x.shape[-1]).astype(jnp.float32)
    n = len(params)
    for k, (w, b) in enumerate(params):
        h = h @ w.T + b
        if k < n - 1:
            if act == "cos":
                h = jnp.cos(h)
            elif act == "sin":
                h = jnp.sin(h)
            else:
                h = jnp.maximum(h, 0.0)
    return h.reshape(*lead_shape, -1).astype(x.dtype)


if __name__ == "__main__":
    # MLPRefiner(in_dim=16, out_dim=3, hidden_list=[32, 32]) with default ReLU.
    in_dim, out_dim, hidden_list = 16, 3, [32, 32]
    B, Q = 2, 256  # leading dims (batch x query points) -> N = 512 rows
                   # (gives >= 2 parallel grid steps so both v7x TCs get work)

    key = jax.random.PRNGKey(0)
    key, kx = jax.random.split(key)
    x = jax.random.normal(kx, (B, Q, in_dim), jnp.float32)

    params = init_mlp_params(key, in_dim, out_dim, hidden_list)

    # Default ReLU path.
    y = mlp_refiner_forward(x, params, act=None, tile_rows=512)
    y = jax.block_until_ready(y)
    y_ref = _reference_forward(x, params, act=None)
    assert y.shape == (B, Q, out_dim), y.shape
    assert jnp.allclose(y, y_ref, atol=1e-5, rtol=1e-5), "ReLU path mismatch"

    # 'sin' activation path (LIIF variant).
    y_sin = mlp_refiner_forward(x, params, act="sin", tile_rows=512)
    y_sin = jax.block_until_ready(y_sin)
    y_sin_ref = _reference_forward(x, params, act="sin")
    assert jnp.allclose(y_sin, y_sin_ref, atol=1e-5, rtol=1e-5), "sin path mismatch"

    print("KERNEL_OK")
</pallas_src>

<mosaic_0001>
module attributes {stable_mosaic.version = 11 : i64} {
  func.func @kernel(%arg0: i32, %arg1: memref<16x256xf32, #tpu.memory_space<vmem>>, %arg2: memref<32x16xf32, #tpu.memory_space<vmem>>, %arg3: memref<32x1xf32, #tpu.memory_space<vmem>>, %arg4: memref<32x32xf32, #tpu.memory_space<vmem>>, %arg5: memref<32x1xf32, #tpu.memory_space<vmem>>, %arg6: memref<3x32xf32, #tpu.memory_space<vmem>>, %arg7: memref<3x1xf32, #tpu.memory_space<vmem>>, %arg8: memref<3x256xf32, #tpu.memory_space<vmem>>) attributes {dimension_semantics = [#tpu.dimension_semantics<parallel>], iteration_bounds = array<i64: 2>, scalar_prefetch = 0 : i64, scratch_operands = 0 : i64, tpu.core_type = #tpu.core_type<tc>, window_params = [{transform_indices = @transform_0, window_bounds = array<i64: 16, 256>}, {pipeline_mode = #tpu.pipeline_mode<synchronous>, transform_indices = @transform_1, window_bounds = array<i64: 32, 16>}, {pipeline_mode = #tpu.pipeline_mode<synchronous>, transform_indices = @transform_2, window_bounds = array<i64: 32, 1>}, {pipeline_mode = #tpu.pipeline_mode<synchronous>, transform_indices = @transform_3, window_bounds = array<i64: 32, 32>}, {pipeline_mode = #tpu.pipeline_mode<synchronous>, transform_indices = @transform_4, window_bounds = array<i64: 32, 1>}, {pipeline_mode = #tpu.pipeline_mode<synchronous>, transform_indices = @transform_5, window_bounds = array<i64: 3, 32>}, {pipeline_mode = #tpu.pipeline_mode<synchronous>, transform_indices = @transform_6, window_bounds = array<i64: 3, 1>}, {transform_indices = @transform_7, window_bounds = array<i64: 3, 256>}]} {
    %c0 = arith.constant 0 : index
    %c0_0 = arith.constant 0 : index
    %0 = vector.load %arg1[%c0, %c0_0] : memref<16x256xf32, #tpu.memory_space<vmem>>, vector<16x256xf32>
    %c0_1 = arith.constant 0 : index
    %c0_2 = arith.constant 0 : index
    %1 = vector.load %arg2[%c0_1, %c0_2] : memref<32x16xf32, #tpu.memory_space<vmem>>, vector<32x16xf32>
    %c0_3 = arith.constant 0 : index
    %c0_4 = arith.constant 0 : index
    %2 = vector.load %arg3[%c0_3, %c0_4] : memref<32x1xf32, #tpu.memory_space<vmem>>, vector<32x1xf32>
    %cst = arith.constant dense<0.000000e+00> : vector<32x256xf32>
    %3 = tpu.matmul %1, %0, %cst {dimension_numbers = #tpu.dot_dimension_numbers<[1], [0], [0], [1], [0, 0, 1, 1], [], []>} : vector<32x16xf32>, vector<16x256xf32>, vector<32x256xf32> -> vector<32x256xf32>
    %4 = vector.broadcast %2 : vector<32x1xf32> to vector<32x256xf32>
    %5 = arith.addf %3, %4 : vector<32x256xf32>
    %cst_5 = arith.constant 0.000000e+00 : f32
    %6 = vector.broadcast %cst_5 : f32 to vector<32x256xf32>
    %7 = arith.maximumf %5, %6 : vector<32x256xf32>
    %c0_6 = arith.constant 0 : index
    %c0_7 = arith.constant 0 : index
    %8 = vector.load %arg4[%c0_6, %c0_7] : memref<32x32xf32, #tpu.memory_space<vmem>>, vector<32x32xf32>
    %c0_8 = arith.constant 0 : index
    %c0_9 = arith.constant 0 : index
    %9 = vector.load %arg5[%c0_8, %c0_9] : memref<32x1xf32, #tpu.memory_space<vmem>>, vector<32x1xf32>
    %cst_10 = arith.constant dense<0.000000e+00> : vector<32x256xf32>
    %10 = tpu.matmul %8, %7, %cst_10 {dimension_numbers = #tpu.dot_dimension_numbers<[1], [0], [0], [1], [0, 0, 1, 1], [], []>} : vector<32x32xf32>, vector<32x256xf32>, vector<32x256xf32> -> vector<32x256xf32>
    %11 = vector.broadcast %9 : vector<32x1xf32> to vector<32x256xf32>
    %12 = arith.addf %10, %11 : vector<32x256xf32>
    %cst_11 = arith.constant 0.000000e+00 : f32
    %13 = vector.broadcast %cst_11 : f32 to vector<32x256xf32>
    %14 = arith.maximumf %12, %13 : vector<32x256xf32>
    %c0_12 = arith.constant 0 : index
    %c0_13 = arith.constant 0 : index
    %15 = vector.load %arg6[%c0_12, %c0_13] : memref<3x32xf32, #tpu.memory_space<vmem>>, vector<3x32xf32>
    %c0_14 = arith.constant 0 : index
    %c0_15 = arith.constant 0 : index
    %16 = vector.load %arg7[%c0_14, %c0_15] : memref<3x1xf32, #tpu.memory_space<vmem>>, vector<3x1xf32>
    %cst_16 = arith.constant dense<0.000000e+00> : vector<3x256xf32>
    %17 = tpu.matmul %15, %14, %cst_16 {dimension_numbers = #tpu.dot_dimension_numbers<[1], [0], [0], [1], [0, 0, 1, 1], [], []>} : vector<3x32xf32>, vector<32x256xf32>, vector<3x256xf32> -> vector<3x256xf32>
    %18 = vector.broadcast %16 : vector<3x1xf32> to vector<3x256xf32>
    %19 = arith.addf %17, %18 : vector<3x256xf32>
    %c0_17 = arith.constant 0 : index
    %c0_18 = arith.constant 0 : index
    %20 = vector.load %arg8[%c0_17, %c0_18] : memref<3x256xf32, #tpu.memory_space<vmem>>, vector<3x256xf32>
    tpu.vector_store %arg8[%c0_17, %c0_18], %19 {strides = array<i32>} : memref<3x256xf32, #tpu.memory_space<vmem>>, vector<3x256xf32>,
    return
  }
  func.func @transform_0(%arg0: i32) -> (i32, i32) {
    %c0_i32 = arith.constant 0 : i32
    %c0_i32_0 = arith.constant 0 : i32
    return %c0_i32, %arg0 : i32, i32
  }
  func.func @transform_1(%arg0: i32) -> (i32, i32) {
    %c0_i32 = arith.constant 0 : i32
    %c0_i32_0 = arith.constant 0 : i32
    %c0_i32_1 = arith.constant 0 : i32
    return %c0_i32, %c0_i32_0 : i32, i32
  }
  func.func @transform_2(%arg0: i32) -> (i32, i32) {
    %c0_i32 = arith.constant 0 : i32
    %c0_i32_0 = arith.constant 0 : i32
    %c0_i32_1 = arith.constant 0 : i32
    return %c0_i32, %c0_i32_0 : i32, i32
  }
  func.func @transform_3(%arg0: i32) -> (i32, i32) {
    %c0_i32 = arith.constant 0 : i32
    %c0_i32_0 = arith.constant 0 : i32
    %c0_i32_1 = arith.constant 0 : i32
    return %c0_i32, %c0_i32_0 : i32, i32
  }
  func.func @transform_4(%arg0: i32) -> (i32, i32) {
    %c0_i32 = arith.constant 0 : i32
    %c0_i32_0 = arith.constant 0 : i32
    %c0_i32_1 = arith.constant 0 : i32
    return %c0_i32, %c0_i32_0 : i32, i32
  }
  func.func @transform_5(%arg0: i32) -> (i32, i32) {
    %c0_i32 = arith.constant 0 : i32
    %c0_i32_0 = arith.constant 0 : i32
    %c0_i32_1 = arith.constant 0 : i32
    return %c0_i32, %c0_i32_0 : i32, i32
  }
  func.func @transform_6(%arg0: i32) -> (i32, i32) {
    %c0_i32 = arith.constant 0 : i32
    %c0_i32_0 = arith.constant 0 : i32
    %c0_i32_1 = arith.constant 0 : i32
    return %c0_i32, %c0_i32_0 : i32, i32
  }
  func.func @transform_7(%arg0: i32) -> (i32, i32) {
    %c0_i32 = arith.constant 0 : i32
    %c0_i32_0 = arith.constant 0 : i32
    return %c0_i32, %arg0 : i32, i32
  }
}

</mosaic_0001>

<bundles_post_ra>
// kernel: tpu_custom_call.1
= control target key start
LH: loop header
LB: loop body
LE: loop exit
PB: predicated region body
PF: predicated region fallthrough
CT: control target
= control target key end

     0   :  { %12 = vsyncpa [#allocation4], 0  ;;  %s1093_s0 = inlined_call_operand.vmem [shape: f32[16,512], index: 0, kind: input, shape index: {}]   ;;  %s1094_s1 = inlined_call_operand.vmem [shape: f32[32,16], index: 1, kind: input, shape index: {}]   ;;  %s1095_s2 = inlined_call_operand.vmem [shape: f32[32,1], index: 2, kind: input, shape index: {}]   ;;  %s1096_s3 = inlined_call_operand.vmem [shape: f32[32,32], index: 3, kind: input, shape index: {}]   ;;  %s1097_s4 = inlined_call_operand.vmem [shape: f32[32,1], index: 4, kind: input, shape index: {}]   ;;  %s1098_s5 = inlined_call_operand.vmem [shape: f32[3,32], index: 5, kind: input, shape index: {}]   ;;  %s1099_s6 = inlined_call_operand.vmem [shape: f32[3,1], index: 6, kind: input, shape index: {}]   ;;  %s1100_s7 = inlined_call_operand.hbm [shape: f32[3,512], index: 7, kind: output, shape index: {}]  }
   0x1   :  { %14 = vsyncpa [#allocation4 + $0x1], 0  ;;  %s924_s24 = smov 0   ;;  %s926_s25 = smov 0  }
   0x2   :  { %s928_s26 = smov 0   ;;  %s930_s27 = smov 0  }
   0x3 LB: > { %s750_s28 = sadd.s32 4294967295, %s879_s27   ;;  %s751_s29 = sadd.s32 4294967294, %s879_s27   ;;  %s879_s27 = sphi %s930_s27, %s1108_s27   ;;  %s875_s26 = sphi %s928_s26, %s1107_s26   ;;  %s871_s25 = sphi %s926_s25, %s1106_s25   ;;  %s867_s24 = sphi %s924_s24, %s1105_s24  }
   0x4   : > { %s947_s30 = sadd.s32 1, %s879_s27   ;;  %s27_s8 = sadd.s32 1, %s875_s26 }
   0x5   : > { %s24_s9 = ssub.s32 %s879_s27, %s947_s30  ;;  %p34_p0 = scmp.ne.s32.totalorder %s875_s26, %s871_s25 }
   0x6   : > { %p25_p1 = scmp.eq.s32.totalorder %s24_s9, 0  ;;  %p35_p2 = scmp.eq.s32.totalorder %s879_s27, 0 }
   0x7   : > { %p190_p3 = scmp.eq.s32.totalorder %s750_s28, 1  ;;  %p195_p4 = scmp.ne.s32.totalorder %s871_s25, %s867_s24 }
   0x8   : > { %s960_s10 = scalar_select %p25_p1, %s875_s26, %s27_s8  }
   0x9   : > { %p36_p5 = por %p35_p2, %p34_p0  ;;  %p962_p6 = por %p190_p3, %p34_p0 }
   0xa   : > { %p196_p7 = scmp.eq.s32.totalorder %s751_s29, 1  ;;  %p1101_p9 = scmp.ge.s32.totalorder %s879_s27, 2 }
   0xc   : > { %p966_p8 = por %p196_p7, %p195_p4  ;;  %230 = sbr.rel (%p1101_p9) target bundleno = 23 (0x17), region = 40 }
  0x11   : > { %233 = sbr.rel (!%p36_p5) target bundleno = 23 (0x17), region = 44  ;;  %s235_s13 = sand.u32 (%p36_p5), 1, %s875_s26  }
  0x12   : > { %s774_s14 = sshll.u32 (%p36_p5), %s879_s27, 4  ;;  %s754_s15 = sshll.u32 (%p36_p5), %s235_s13, 5 }
  0x13   : > { %s240_s18 = scalar_lea.vmem (%p36_p5), %s1093_s0, %s774_s14  ;;  %s237_s19 = scalar_lea.vmem (%p36_p5), [#allocation2], %s754_s15 }
  0x14   : > { %v253_v0 = vld [vmem:[%s240_s18] sm:$0xff] (%p36_p5)  ;;  %v255_v1 = vld [vmem:[%s240_s18 + $0x8] sm:$0xff] (%p36_p5) }
  0x15   : > { %v257_v2 = vld [vmem:[%s240_s18 + $0x20] sm:$0xff] (%p36_p5)  ;;  %254 = vst [vmem:[%s237_s19] sm:$0xff] (%p36_p5), %v253_v0  ;;  %256 = vst [vmem:[%s237_s19 + $0x8] sm:$0xff] (%p36_p5), %v255_v1  ;;  %v259_v3 = vld [vmem:[%s240_s18 + $0x28] sm:$0xff] (%p36_p5) }
  0x16   : > { %258 = vst [vmem:[%s237_s19 + $0x10] sm:$0xff] %v257_v2  ;;  %260 = vst [vmem:[%s237_s19 + $0x18] sm:$0xff] %v259_v3 }
  0x17 PF: > { %p757_p10 = scmp.ge.s32.totalorder %s879_s27, 1  ;;  %p265_p11 = scmp.lt.s32.totalorder %s879_s27, 3 }
  0x19   : > { %p266_p12 = pnand %p757_p10, %p265_p11 }
  0x1a   : > { %s981_s20 = sand.u32 (!%p266_p12), 1, %s871_s25   ;;  %s883_s15 = smov (!%p266_p12), [#allocation3]  }
  0x1b   : > { %269 = sbr.rel (%p266_p12) target bundleno = 690 (0x2b2), region = 67  ;;  %s758_s21 = sshll.u32 (!%p266_p12), %s981_s20, 5 }
  0x1c   : > { %s274_s9 = scalar_lea.vmem (!%p266_p12), [#allocation2], %s758_s21  ;;  %s759_s19 = sshll.u32 (!%p266_p12), %s981_s20, 3 }
  0x1d   : > { %s775_s21 = sshll.u32 (!%p266_p12), %s750_s28, 7  ;;  %s302_s22 = scalar_lea.vmem (!%p266_p12), [#allocation3], %s759_s19 }
  0x1e   : > { %s686_s23 = sshll.u32 (!%p266_p12), %s302_s22, 4  ;;  %s672_s13 = scalar_lea.sflag (!%p266_p12), [#allocation4], %s981_s20  ;;  %s687_s23 = int_to_ptr.vmem [resolvable:$true] %s686_s23 }
  0x1f   : > { %s819_s14 = scalar_lea.vmem (!%p266_p12), %s687_s23, 128  ;;  %s823_s16 = sshll.u32 (!%p266_p12), %s883_s15, 4  ;;  %s824_s16 = int_to_ptr.vmem [resolvable:$false] %s823_s16 }
  0x20   : > { %v881_v4 = vmov 0.0   ;;  %v316_v5 = vld [vmem:[%s1095_s2 + $0x18] sm:$0xff]  ;;  %v314_v6 = vld [vmem:[%s1095_s2 + $0x8] sm:$0xff]  ;;  %v882_v7 = vmov 0   ;;  %v307_v9 = vld [vmem:[%s274_s9 + $0x10] sm:$0xff]  ;;  %vm337_vm0 = vcmask 130048   ;;  %p820_p13 = scmp.ne.s32.totalorder %s687_s23, %s819_s14  ;;  %p826_p2 = scmp.lt.s32.totalorder %s687_s23, %s824_s16 }
  0x21   : > { %414 = vmatprep.mubr.f32.mxu0 %v881_v4  ;;  %552 = vmatprep.mubr.f32.mxu1 %v881_v4  ;;  %v308_v8 = vld [vmem:[%s274_s9 + $0x18] sm:$0xff]  ;;  %v306_v10 = vld [vmem:[%s274_s9 + $0x8] sm:$0xff]  ;;  %v305_v11 = vld [vmem:[%s274_s9] sm:$0xff]  ;;  %vm475_vm1 = vcmask 261120   ;;  %s684_s9 = scalar_lea.hbm %s1100_s7, %s775_s21  ;;  %s825_s28 = scalar_lea.vmem %s824_s16, 256 }
  0x22   : > { %818 = vset.pattern.permute.xlu1 %v882_v7  ;;  %817 = vset.pattern.permute.xlu0 %v882_v7  ;;  %v315_v12 = vld [vmem:[%s1095_s2 + $0x10] sm:$0xff]  ;;  %v309_v13 = vld [vmem:[%s1094_s1] sm:$0xff]  ;;  %v454_v15 = vld [vmem:[%s1097_s4 + $0x18] sm:$0xff]  ;;  %p821_p0 = pnand %p820_p13, %p962_p6  ;;  %p827_p3 = scmp.lt.s32.totalorder %s825_s28, %s819_s14 }
  0x23   : > { %334 = vperm.xlu0 %817, %v316_v5   ;;  %324 = vperm.xlu1 %818, %v314_v6   ;;  %v313_v14 = vld [vmem:[%s1095_s2] sm:$0xff]  ;;  %v310_v16 = vld [vmem:[%s1094_s1 + $0x8] sm:$0xff]  ;;  %v453_v17 = vld [vmem:[%s1097_s4 + $0x10] sm:$0xff] }
  0x24   : > { %378 = vmatprep.subr.mxu0 %v308_v8  ;;  %v452_v18 = vld [vmem:[%s1097_s4 + $0x8] sm:$0xff]  ;;  %v311_v19 = vld [vmem:[%s1094_s1 + $0x10] sm:$0xff]  ;;  %v451_v20 = vld [vmem:[%s1097_s4] sm:$0xff]  ;;  %p822_p1 = pneg %p821_p0  ;;  %p828_p4 = por %p827_p3, %p826_p2 }
  0x25   : > { %379 = vmatpush1.msra.mxu0 %v307_v9  ;;  %v586_v21 = vld [vmem:[%s1099_s6] sm:$0x7]  ;;  %v312_v22 = vld [vmem:[%s1094_s1 + $0x18] sm:$0xff]  ;;  %v448_v52 = vld [vmem:[%s1096_s3 + $0x8] sm:$0xff] }
  0x26   : > { %380 = vmatprep.subr.mxu0 %v306_v10  ;;  %v447_v51 = vld [vmem:[%s1096_s3] sm:$0xff]  ;;  %v449_v53 = vld [vmem:[%s1096_s3 + $0x10] sm:$0xff]  ;;  %v450_v54 = vld [vmem:[%s1096_s3 + $0x18] sm:$0xff]  ;;  %p829_p5 = pnand %p828_p4, %p822_p1 }
  0x27   : > { %381 = vmatpush1.msra.mxu0 %v305_v11  ;;  %329 = vperm.xlu0 %817, %v315_v12  }
  0x28   : > { %760 = vmatmul.mubr.msk.f32.vlgmr.msra.gmra.mxu0 %vm337_vm0, %v309_v13  ;;  %319 = vperm.xlu1 %818, %v313_v14  }
  0x29   : > { %420 = vmatprep.mubr.f32.mxu0 %v881_v4 }
  0x2b   : > { %472 = vperm.xlu0 %817, %v454_v15  }
  0x2c   : > { %761 = vmatmul.mubr.msk.f32.gmra.mxu0 %vm337_vm0, %v310_v16  ;;  %467 = vperm.xlu1 %818, %v453_v17  }
  0x2d   : > { %426 = vmatprep.mubr.f32.mxu0 %v881_v4 }
  0x2f   : > { %462 = vperm.xlu0 %817, %v452_v18  }
  0x30   : > { %762 = vmatmul.mubr.msk.f32.gmra.mxu0 %vm337_vm0, %v311_v19  ;;  %457 = vperm.xlu1 %818, %v451_v20   ;;  %v585_v19 = vld [vmem:[%s1098_s5] sm:$0x7] }
  0x31   : > { %432 = vmatprep.mubr.f32.mxu0 %v881_v4 }
  0x33   : > { %589 = vperm.xlu0 %817, %v586_v21  }
  0x34   : > { %763 = vmatmul.mubr.msk.f32.gmra.mxu0 %vm337_vm0, %v312_v22 }
  0x35   : > { %659 = vmatprep.mubr.f32.mxu0 %v881_v4 }
  0x9e   : > { %v335_v27 = vpop.permute.xlu0 %334  ;;  %v325_v30 = vpop.permute.xlu1 %324 }
  0xa2   : > { %v330_v32 = vpop.permute.xlu0 %329 }
  0xa3   : > { %v320_v38 = vpop.permute.xlu1 %319 }
  0xa6   : > { %v473_v60 = vpop.permute.xlu0 %472 }
  0xa7   : > { %v468_v62 = vpop.permute.xlu1 %467 }
  0xab   : > { %v458_v8 = vpop.permute.xlu1 %457 }
  0xe8   : > { %v416_v23 = vpop.f32.mrf.mxu0 }
  0xe9   : > { %v417_v45 = vadd.f32 %v416_v23, %v320_v38 }
  0xea   : > { %v418_v24 = vpop.f32.mrf.mxu0 }
  0xeb   : > { %v419_v43 = vadd.f32 %v418_v24, %v320_v38  ;;  %v439_v50 = vmax.f32 %v417_v45, 0.0 }
  0xec   : > { %v422_v25 = vpop.f32.mrf.mxu0 }
  0xed   : > { %v423_v41 = vadd.f32 %v422_v25, %v325_v30  ;;  %v440_v49 = vmax.f32 %v419_v43, 0.0 }
  0xee   : > { %v424_v26 = vpop.f32.mrf.mxu0 }
  0xef   : > { %v425_v39 = vadd.f32 %v424_v26, %v325_v30  ;;  %v441_v48 = vmax.f32 %v423_v41, 0.0 }
  0xf0   : > { %v428_v28 = vpop.f32.mrf.mxu0 }
  0xf1   : > { %v429_v37 = vadd.f32 %v428_v28, %v330_v32  ;;  %v442_v47 = vmax.f32 %v425_v39, 0.0 }
  0xf2   : > { %v430_v29 = vpop.f32.mrf.mxu0 }
  0xf3   : > { %v431_v35 = vadd.f32 %v430_v29, %v330_v32  ;;  %v443_v46 = vmax.f32 %v429_v37, 0.0 }
  0xf4   : > { %v434_v31 = vpop.f32.mrf.mxu0 }
  0xf5   : > { %v435_v33 = vadd.f32 %v434_v31, %v335_v27  ;;  %v444_v44 = vmax.f32 %v431_v35, 0.0 }
  0xf6   : > { %v436_v34 = vpop.f32.mrf.mxu0 }
  0xf7   : > { %v437_v36 = vadd.f32 %v436_v34, %v335_v27  ;;  %v445_v42 = vmax.f32 %v435_v33, 0.0 }
  0xf9   : > { %v446_v40 = vmax.f32 %v437_v36, 0.0 }
  0xfb   : > { %512 = vmatprep.subr.mxu1 %v446_v40 }
  0xfc   : > { %513 = vmatpush1.msra.mxu1 %v445_v42 }
  0xfd   : > { %514 = vmatprep.subr.mxu1 %v444_v44 }
  0xfe   : > { %515 = vmatpush1.msra.mxu1 %v443_v46 }
  0xff   : > { %516 = vmatprep.subr.mxu1 %v442_v47 }
 0x100   : > { %517 = vmatpush1.msra.mxu1 %v441_v48 }
 0x101   : > { %518 = vmatprep.subr.mxu1 %v440_v49 }
 0x102   : > { %519 = vmatpush1.msra.mxu1 %v439_v50 }
 0x103   : > { %764 = vmatmul.mubr.msk.f32.vlgmr.msra.gmra.mxu1 %vm475_vm1, %v447_v51 }
 0x104   : > { %558 = vmatprep.mubr.f32.mxu1 %v881_v4 }
 0x107   : > { %765 = vmatmul.mubr.msk.f32.gmra.mxu1 %vm475_vm1, %v448_v52 }
 0x108   : > { %564 = vmatprep.mubr.f32.mxu1 %v881_v4 }
 0x10b   : > { %766 = vmatmul.mubr.msk.f32.gmra.mxu1 %vm475_vm1, %v449_v53 }
 0x10c   : > { %570 = vmatprep.mubr.f32.mxu1 %v881_v4  ;;  %v463_v4 = vpop.permute.xlu0 %462 }
 0x10f   : > { %767 = vmatmul.mubr.msk.f32.gmra.mxu1 %vm475_vm1, %v450_v54 }
 0x110   : > { %v590_v21 = vpop.permute.xlu0 %589 }
 0x1c3   : > { %v554_v55 = vpop.f32.mrf.mxu1 }
 0x1c4   : > { %v555_v13 = vadd.f32 %v554_v55, %v458_v8 }
 0x1c5   : > { %v556_v56 = vpop.f32.mrf.mxu1 }
 0x1c6   : > { %v557_v11 = vadd.f32 %v556_v56, %v458_v8  ;;  %v577_v18 = vmax.f32 %v555_v13, 0.0 }
 0x1c7   : > { %v560_v57 = vpop.f32.mrf.mxu1 }
 0x1c8   : > { %v561_v9 = vadd.f32 %v560_v57, %v463_v4  ;;  %v578_v17 = vmax.f32 %v557_v11, 0.0 }
 0x1c9   : > { %v562_v58 = vpop.f32.mrf.mxu1 }
 0x1ca   : > { %v563_v6 = vadd.f32 %v562_v58, %v463_v4  ;;  %v579_v16 = vmax.f32 %v561_v9, 0.0 }
 0x1cb   : > { %v566_v59 = vpop.f32.mrf.mxu1 }
 0x1cc   : > { %v567_v5 = vadd.f32 %v566_v59, %v468_v62  ;;  %v580_v15 = vmax.f32 %v563_v6, 0.0 }
 0x1cd   : > { %v568_v61 = vpop.f32.mrf.mxu1 }
 0x1ce   : > { %v569_v2 = vadd.f32 %v568_v61, %v468_v62  ;;  %v581_v14 = vmax.f32 %v567_v5, 0.0 }
 0x1cf   : > { %v572_v63 = vpop.f32.mrf.mxu1 }
 0x1d0   : > { %v573_v0 = vadd.f32 %v572_v63, %v473_v60  ;;  %v582_v12 = vmax.f32 %v569_v2, 0.0 }
 0x1d1   : > { %v574_v1 = vpop.f32.mrf.mxu1 }
 0x1d2   : > { %v575_v3 = vadd.f32 %v574_v1, %v473_v60  ;;  %v583_v10 = vmax.f32 %v573_v0, 0.0 }
 0x1d4   : > { %v584_v7 = vmax.f32 %v575_v3, 0.0 }
 0x1d6   : > { %619 = vmatprep.subr.mxu0 %v584_v7 }
 0x1d7   : > { %620 = vmatpush1.msra.mxu0 %v583_v10 }
 0x1d8   : > { %621 = vmatprep.subr.mxu0 %v582_v12 }
 0x1d9   : > { %622 = vmatpush1.msra.mxu0 %v581_v14 }
 0x1da   : > { %623 = vmatprep.subr.mxu0 %v580_v15 }
 0x1db   : > { %624 = vmatpush1.msra.mxu0 %v579_v16 }
 0x1dc   : > { %625 = vmatprep.subr.mxu0 %v578_v17 }
 0x1dd   : > { %626 = vmatpush1.msra.mxu0 %v577_v18 }
 0x1de   : > { %768 = vmatmul.mubr.msk.f32.vlgmr.msra.gmra.mxu0 %vm475_vm1, %v585_v19 }
 0x29e   : > { %v661_v20 = vpop.f32.mrf.mxu0 }
 0x29f   : > { %v662_v23 = vadd.f32 %v661_v20, %v590_v21 }
 0x2a0   : > { %v663_v22 = vpop.f32.mrf.mxu0 }
 0x2a1   : > { %v664_v24 = vadd.f32 %v663_v22, %v590_v21 }
 0x2a3   : > { %v668_v25 = vcombine.low %v662_v23, %v664_v24 }
 0x2a5   : > { %670 = vst [vmem:[%s302_s22] sm:$0x77] %v668_v25 }
 0x2a6   : > { %832 = shalt.err (!%p829_p5)
}
 0x2a7   : > { %s833_s17 = scalar_lea.hbm %s684_s9, 128  ;;  %s837_s19 = scalar_lea.hbm %s1100_s7, 256 }
 0x2a8   : > { %p834_p7 = scmp.ne.s32.totalorder %s684_s9, %s833_s17  ;;  %p838_p12 = scmp.lt.s32.totalorder %s684_s9, %s1100_s7 }
 0x2a9   : > { %p839_p13 = scmp.lt.s32.totalorder %s837_s19, %s833_s17 }
 0x2aa   : > { %p835_p10 = pnand %p834_p7, %p962_p6 }
 0x2ab   : > { %p840_p0 = por %p839_p13, %p838_p12 }
 0x2ac   : > { %p836_p11 = pneg %p835_p10 }
 0x2ae   : > { %p841_p9 = pnand %p840_p0, %p836_p11 }
 0x2b0   : > { %844 = shalt.err (!%p841_p9)
}
 0x2b1   : > { %776 = dma.vmem_to_hbm [thread:$0]  (%p962_p6), %s687_s23, 128, %s684_s9, %s672_s13  }
 0x2b2 PF: > { %s698_s29 = sand.u32 1, %s867_s24   ;;  %p1104_p1 = scmp.ge.s32.totalorder %s879_s27, 2 }
 0x2b3   : > { %s699_s8 = scalar_lea.sflag [#allocation4], %s698_s29 }
 0x2b4   : > { %p779_p2 = pnand %p1104_p1, %p966_p8 }
 0x2b6   : > { %p780_p3 = pneg %p779_p2 }
 0x2b8   : > { %862 = dma.done.wait (%p780_p3), %s699_s8, 128  }
 0x2b9   : > { %864 = vsyncadd (%p780_p3), %s699_s8, 4294967168  ;;  %p17_p9 = scmp.ge.s32.totalorder %s947_s30, 4   ;;  %s1105_s24 = smov %s871_s25 }
 0x2ba   : > { %s1106_s25 = smov %s875_s26  ;;  %s1107_s26 = smov %s960_s10 }
 0x2bb   : > { %s1108_s27 = smov %s947_s30  ;;  %19 = sbr.rel (!%p17_p9) target bundleno = 3 (0x3), region = 111 }
 0x2c0   :  { %704 = vsyncpa [#allocation4], 1 }
 0x2c1   :  { %706 = vsyncpa [#allocation4 + $0x1], 1 }

</bundles_post_ra>
